<compile_context>
chip_gen: v7x
topology: tpu7x:2x2x1
jax: 0.10.0
libtpu: 0.0.40
codegen_flags: <defaults>
</compile_context>

<pallas_src>
import jax
import jax.numpy as jnp
from jax import lax
from jax.experimental import pallas as pl
from jax.experimental.pallas import tpu as pltpu

DEFAULT_TOKENS_PER_TILE = 1024   # tokens per grid step (before budget clamps)
ONEHOT_VMEM_BUDGET = 4 << 20     # cap on the (tile, V) one-hot temporary


def _round_up(x, m):
    return (x + m - 1) // m * m


def _make_embedding_kernel(vocab_size, precision):
    def kernel(ids_ref, table_ref, out_ref):
        # ids_ref   : VMEM (tile, 1) int32  -- this tile's token ids (sublane axis)
        # table_ref : VMEM (V, H)           -- whole embedding table, resident
        # out_ref   : VMEM (tile, H)
        ids = ids_ref[...]                                            # (tile, 1)
        cols = lax.broadcasted_iota(jnp.int32, (1, vocab_size), 1)    # (1, V)
        one_hot = (ids == cols).astype(table_ref.dtype)               # (tile, V)
        out_ref[...] = jnp.dot(
            one_hot, table_ref[...],
            preferred_element_type=jnp.float32,
            precision=precision,
        ).astype(out_ref.dtype)

    return kernel


def embedding_vocabulary_forward(input_ids, word_embeddings,
                                 tokens_per_tile=DEFAULT_TOKENS_PER_TILE):
    """Pallas equivalent of EmbeddingVocabulary.forward(input_ids)."""
    B, S = input_ids.shape
    V, H = word_embeddings.shape
    num_tokens = B * S
    dtype = word_embeddings.dtype
    itemsize = jnp.dtype(dtype).itemsize

    # --- tile sizing ---------------------------------------------------------
    sub = max(8, 32 // itemsize)            # sublane packing granularity (8 f32, 16 bf16, 32 int8)
    v_pad = _round_up(V, 128)
    max_tile = max(sub, (ONEHOT_VMEM_BUDGET // (v_pad * itemsize)) // sub * sub)
    tile = min(tokens_per_tile, max_tile, _round_up(num_tokens, sub))
    tile = _round_up(tile, sub)
    padded_tokens = _round_up(num_tokens, tile)

    flat_ids = input_ids.reshape(num_tokens).astype(jnp.int32)
    if padded_tokens != num_tokens:
        # Padding ids are 0; their rows are sliced off the output below.
        flat_ids = jnp.pad(flat_ids, (0, padded_tokens - num_tokens))
    ids2d = flat_ids.reshape(padded_tokens, 1)

    # --- VMEM budget / scoped limit -----------------------------------------
    vmem_need = (2 * V * H * itemsize          # resident table (pipeline double-buffers it)
                 + 2 * tile * H * itemsize     # output blocks (double-buffered)
                 + 2 * tile * 128 * 4          # (tile, 1) id blocks pad to 128 lanes
                 + tile * v_pad * itemsize     # one-hot temporary
                 + (2 << 20))                  # compiler headroom
    try:
        vmem_cap = int(pltpu.get_tpu_info().vmem_capacity_bytes)
    except Exception:
        vmem_cap = 64 << 20                    # v7x per-TC capacity: safe lower bound
    vmem_limit = int(min(max(32 << 20, vmem_need * 3 // 2), vmem_cap - (2 << 20)))

    precision = lax.Precision.HIGHEST if dtype == jnp.float32 else None
    kernel = _make_embedding_kernel(V, precision)

    out_flat = pl.pallas_call(
        kernel,
        out_shape=jax.ShapeDtypeStruct((padded_tokens, H), dtype),
        grid_spec=pltpu.PrefetchScalarGridSpec(
            num_scalar_prefetch=0,
            grid=(padded_tokens // tile,),
            in_specs=[pl.BlockSpec((tile, 1), lambda i: (i, 0)),   # per-tile ids
                      pl.BlockSpec((V, H), lambda i: (0, 0))],     # resident table
            out_specs=pl.BlockSpec((tile, H), lambda i: (i, 0)),
        ),
        compiler_params=pltpu.CompilerParams(
            dimension_semantics=("parallel",),   # independent tiles -> v7x 2 TCs
            vmem_limit_bytes=vmem_limit),
    )(ids2d, word_embeddings)

    return out_flat[:num_tokens].reshape(B, S, H)


if __name__ == "__main__":
    key = jax.random.PRNGKey(0)

    # --- Case 1: small shapes matching the module's toy configuration. ------
    V, H = 64, 128            # V == len(ngram_dict), H == input_shape[1]
    B, S = 2, 8
    k_tab, k_ids, key = jax.random.split(key, 3)
    word_embeddings = jax.random.normal(k_tab, (V, H), dtype=jnp.float32)
    input_ids = jax.random.randint(k_ids, (B, S), 0, V, dtype=jnp.int32)

    out = embedding_vocabulary_forward(input_ids, word_embeddings)
    out = jax.block_until_ready(out)
    ref = jnp.take(word_embeddings, input_ids, axis=0)
    assert out.shape == (B, S, H)
    assert jnp.allclose(out, ref, rtol=1e-5, atol=1e-6), \
        "Pallas one-hot gather mismatch vs reference (case 1)"

    # --- Case 2: multi-tile grid exercising padding + 1024-token tiles. -----
    V2, H2 = 1000, 256
    B2, S2 = 4, 500           # 2000 tokens -> padded to 2048 -> 2 tiles of 1024
    k_tab2, k_ids2, key = jax.random.split(key, 3)
    word_embeddings2 = jax.random.normal(k_tab2, (V2, H2), dtype=jnp.float32)
    input_ids2 = jax.random.randint(k_ids2, (B2, S2), 0, V2, dtype=jnp.int32)

    out2 = embedding_vocabulary_forward(input_ids2, word_embeddings2)
    out2 = jax.block_until_ready(out2)
    ref2 = jnp.take(word_embeddings2, input_ids2, axis=0)
    assert out2.shape == (B2, S2, H2)
    assert jnp.allclose(out2, ref2, rtol=1e-5, atol=1e-6), \
        "Pallas one-hot gather mismatch vs reference (case 2)"

    print("KERNEL_OK")
</pallas_src>

<mosaic_0001>
module attributes {stable_mosaic.version = 11 : i64} {
  func.func @kernel(%arg0: i32, %arg1: memref<16x1xi32, #tpu.memory_space<vmem>>, %arg2: memref<64x128xf32, #tpu.memory_space<vmem>>, %arg3: memref<16x128xf32, #tpu.memory_space<vmem>>) attributes {dimension_semantics = [#tpu.dimension_semantics<parallel>], iteration_bounds = array<i64: 1>, scalar_prefetch = 0 : i64, scratch_operands = 0 : i64, tpu.core_type = #tpu.core_type<tc>, window_params = [{transform_indices = @transform_0, window_bounds = array<i64: 16, 1>}, {pipeline_mode = #tpu.pipeline_mode<synchronous>, transform_indices = @transform_1, window_bounds = array<i64: 64, 128>}, {transform_indices = @transform_2, window_bounds = array<i64: 16, 128>}]} {
    %c0 = arith.constant 0 : index
    %c0_0 = arith.constant 0 : index
    %0 = vector.load %arg1[%c0, %c0_0] : memref<16x1xi32, #tpu.memory_space<vmem>>, vector<16x1xi32>
    %1 = tpu.iota {dimensions = array<i32: 1>} : vector<1x64xi32>
    %2 = vector.broadcast %0 : vector<16x1xi32> to vector<16x64xi32>
    %3 = vector.broadcast %1 : vector<1x64xi32> to vector<16x64xi32>
    %4 = arith.cmpi eq, %2, %3 : vector<16x64xi32>
    %5 = arith.extui %4 : vector<16x64xi1> to vector<16x64xi32>
    %6 = arith.sitofp %5 : vector<16x64xi32> to vector<16x64xf32>
    %c0_1 = arith.constant 0 : index
    %c0_2 = arith.constant 0 : index
    %7 = vector.load %arg2[%c0_1, %c0_2] : memref<64x128xf32, #tpu.memory_space<vmem>>, vector<64x128xf32>
    %cst = arith.constant dense<0.000000e+00> : vector<16x128xf32>
    %8 = tpu.matmul %6, %7, %cst {dimension_numbers = #tpu.dot_dimension_numbers<[1], [0], [0], [1], [0, 0, 1, 1], [], []>, precision = #tpu.contract_precision<fp32>} : vector<16x64xf32>, vector<64x128xf32>, vector<16x128xf32> -> vector<16x128xf32>
    %c0_3 = arith.constant 0 : index
    %c0_4 = arith.constant 0 : index
    %9 = vector.load %arg3[%c0_3, %c0_4] : memref<16x128xf32, #tpu.memory_space<vmem>>, vector<16x128xf32>
    tpu.vector_store %arg3[%c0_3, %c0_4], %8 {strides = array<i32>} : memref<16x128xf32, #tpu.memory_space<vmem>>, vector<16x128xf32>,
    return
  }
  func.func @transform_0(%arg0: i32) -> (i32, i32) {
    %c0_i32 = arith.constant 0 : i32
    %c0_i32_0 = arith.constant 0 : i32
    return %arg0, %c0_i32 : i32, i32
  }
  func.func @transform_1(%arg0: i32) -> (i32, i32) {
    %c0_i32 = arith.constant 0 : i32
    %c0_i32_0 = arith.constant 0 : i32
    %c0_i32_1 = arith.constant 0 : i32
    return %c0_i32, %c0_i32_0 : i32, i32
  }
  func.func @transform_2(%arg0: i32) -> (i32, i32) {
    %c0_i32 = arith.constant 0 : i32
    %c0_i32_0 = arith.constant 0 : i32
    return %arg0, %c0_i32 : i32, i32
  }
}

</mosaic_0001>

<bundles_post_ra>
// kernel: tpu_custom_call.1
= control target key start
LH: loop header
LB: loop body
LE: loop exit
PB: predicated region body
PF: predicated region fallthrough
CT: control target
= control target key end

     0   :  { %7 = vsyncpa [#allocation3], 0  ;;  %s1100_s0 = inlined_call_operand.vmem [shape: s32[16,1], index: 0, kind: input, shape index: {}]   ;;  %s1101_s1 = inlined_call_operand.hbm [shape: f32[64,128], index: 1, kind: input, shape index: {}]   ;;  %s1102_s2 = inlined_call_operand.hbm [shape: f32[16,128], index: 2, kind: output, shape index: {}]  }
   0x1   :  { %8 = vsyncpa [#allocation4], 0  ;;  %s999_s9 = smov [#allocation2]   ;;  %s951_s13 = scalar_lea.hbm %s1101_s1, 1024 }
   0x2   :  { %s16_s10 = sshll.u32 %s999_s9, 4  ;;  %p952_p0 = scmp.ne.s32.totalorder %s1101_s1, %s951_s13  ;;  %s17_s10 = int_to_ptr.vmem [resolvable:$true] %s16_s10 }
   0x3   :  { %p955_p1 = scmp.lt.u32.totalorder %s951_s13, %s1101_s1 }
   0x5   :  { %p957_p2 = pnand %p955_p1, %p952_p0 }
   0x7   :  { %960 = shalt.err (!%p957_p2)
}
   0x8   :  { %s961_s18 = scalar_lea.vmem %s17_s10, 1024  ;;  %p966_p4 = scmp.lt.s32.totalorder %s17_s10, %s17_s10 }
   0x9   :  { %p962_p3 = scmp.ne.s32.totalorder %s17_s10, %s961_s18  ;;  %p967_p5 = scmp.lt.s32.totalorder %s961_s18, %s961_s18 }
   0xb   :  { %p968_p6 = por %p967_p5, %p966_p4 }
   0xd   :  { %p969_p7 = pnand %p968_p6, %p962_p3 }
   0xf   :  { %972 = shalt.err (!%p969_p7)
}
  0x10   :  { %s1000_s19 = smov 128   ;;  %s1001_s20 = smov 8  }
  0x11   :  { %22 = dma.hbm_to_vmem [thread:$0]  %s1101_s1, 1024, %s17_s10, [#allocation3], %s1000_s19, %s1000_s19, %s1001_s20  }
  0x12   :  { %995 = dma.done.wait [#allocation3], 1024  }
  0x13   :  { %996 = vsyncadd [#allocation3], 4294966272  ;;  %v1002_v0 = vmov 0   ;;  %v26_v1 = vld [vmem:[%s1100_s0] sm:$0xff]  ;;  %v43_v3 = vld [vmem:[#allocation2 + $0x8] sm:$0xff]  ;;  %vm50_vm0 = vcmask 523264  }
  0x14   :  { %950 = vset.pattern.permute.xlu0 %v1002_v0  ;;  %v42_v2 = vld [vmem:[#allocation2] sm:$0xff]  ;;  %v44_v5 = vld [vmem:[#allocation2 + $0x10] sm:$0xff]  ;;  %v45_v6 = vld [vmem:[#allocation2 + $0x18] sm:$0xff]  ;;  %v61_v8 = vand.u32 4294901760, %v43_v3 }
  0x15   :  { %31 = vperm.xlu0 %950, %v26_v1   ;;  %v58_v4 = vand.u32 4294901760, %v42_v2  ;;  %v27_v7 = vld [vmem:[%s1100_s0 + $0x8] sm:$0xff]  ;;  %v64_v9 = vand.u32 4294901760, %v44_v5  ;;  %v67_v10 = vand.u32 4294901760, %v45_v6  ;;  %v46_v11 = vld [vmem:[#allocation2 + $0x20] sm:$0xff]  ;;  %v48_v17 = vld [vmem:[#allocation2 + $0x30] sm:$0xff] }
  0x16   :  { %v47_v12 = vld [vmem:[#allocation2 + $0x28] sm:$0xff]  ;;  %v70_v15 = vand.u32 4294901760, %v46_v11  ;;  %v49_v18 = vld [vmem:[#allocation2 + $0x38] sm:$0xff]  ;;  %v159_v20 = vsub.f32 %v43_v3, %v61_v8  ;;  %v76_v21 = vand.u32 4294901760, %v48_v17  ;;  %v28_v3 = vlaneseq  ;;  %s1004_s0 = smov [#allocation5]  }
  0x17   :  { %v1041_v13 = vpack.c.bf16 %v61_v8, %v58_v4  ;;  %v1043_v14 = vpack.c.bf16 %v67_v10, %v64_v9  ;;  %v73_v16 = vand.u32 4294901760, %v47_v12  ;;  %v152_v19 = vsub.f32 %v42_v2, %v58_v4  ;;  %s644_s1 = sshll.u32 %s1004_s0, 4  ;;  %s645_s1 = int_to_ptr.vmem [resolvable:$true] %s644_s1 }
  0x18   :  { %v79_v22 = vand.u32 4294901760, %v49_v18  ;;  %v160_v24 = vand.u32 4294901760, %v159_v20  ;;  %v166_v28 = vsub.f32 %v44_v5, %v64_v9  ;;  %v173_v29 = vsub.f32 %v45_v6, %v67_v10  ;;  %s973_s27 = scalar_lea.vmem %s645_s1, 256  ;;  %p978_p9 = scmp.lt.s32.totalorder %s645_s1, %s645_s1 }
  0x19   :  { %34 = vperm.xlu0 %950, %v27_v7   ;;  %887 = vmatprep.subr.bf16.mxu0 %v1041_v13  ;;  %v153_v23 = vand.u32 4294901760, %v152_v19  ;;  %v1051_v25 = vpack.c.bf16 %v73_v16, %v70_v15  ;;  %v180_v38 = vsub.f32 %v46_v11, %v70_v15  ;;  %v187_v39 = vsub.f32 %v47_v12, %v73_v16  ;;  %p974_p8 = scmp.ne.s32.totalorder %s645_s1, %s973_s27  ;;  %p979_p10 = scmp.lt.s32.totalorder %s973_s27, %s973_s27 }
  0x1a   :  { %839 = vmatprep.subr.bf16.mxu1 %v1041_v13  ;;  %889 = vmatpush3.bf16.msra.mxu0 %v1041_v13  ;;  %v161_v27 = vsub.f32 %v159_v20, %v160_v24  ;;  %v1055_v30 = vpack.c.bf16 %v79_v22, %v76_v21  ;;  %v167_v33 = vand.u32 4294901760, %v166_v28  ;;  %v174_v34 = vand.u32 4294901760, %v173_v29 }
  0x1b   :  { %841 = vmatpush3.bf16.msra.mxu1 %v1041_v13  ;;  %891 = vmatprep.subr.bf16.mxu0 %v1043_v14  ;;  %v154_v26 = vsub.f32 %v152_v19, %v153_v23  ;;  %v902_v40 = vpack.c.bf16 %v160_v24, %v153_v23  ;;  %v181_v44 = vand.u32 4294901760, %v180_v38  ;;  %v188_v45 = vand.u32 4294901760, %v187_v39  ;;  %p980_p11 = por %p979_p10, %p978_p9 }
  0x1c   :  { %843 = vmatprep.subr.bf16.mxu1 %v1043_v14  ;;  %v162_v32 = vand.u32 4294901760, %v161_v27  ;;  %v1059_v35 = vpack.c.bf16 %v174_v34, %v167_v33  ;;  %v168_v36 = vsub.f32 %v166_v28, %v167_v33  ;;  %v175_v37 = vsub.f32 %v173_v29, %v174_v34 }
  0x1d   :  { %v155_v31 = vand.u32 4294901760, %v154_v26  ;;  %v194_v47 = vsub.f32 %v48_v17, %v76_v21  ;;  %v201_v48 = vsub.f32 %v49_v18, %v79_v22  ;;  %v910_v49 = vpack.c.bf16 %v188_v45, %v181_v44  ;;  %p981_p12 = pnand %p980_p11, %p974_p8 }
  0x1e   :  { %893 = vmatpush3.bf16.msra.mxu0 %v1043_v14  ;;  %v169_v42 = vand.u32 4294901760, %v168_v36  ;;  %v176_v43 = vand.u32 4294901760, %v175_v37  ;;  %v182_v50 = vsub.f32 %v180_v38, %v181_v44  ;;  %v189_v51 = vsub.f32 %v187_v39, %v188_v45 }
  0x1f   :  { %845 = vmatpush3.bf16.msra.mxu1 %v1043_v14  ;;  %895 = vmatprep.subr.bf16.mxu0 %v1051_v25  ;;  %v854_v41 = vpack.c.bf16 %v162_v32, %v155_v31  ;;  %v195_v52 = vand.u32 4294901760, %v194_v47  ;;  %v202_v53 = vand.u32 4294901760, %v201_v48  ;;  %v870_v63 = vpack.c.bf16 %v159_v20, %v152_v19 }
  0x20   :  { %847 = vmatprep.subr.bf16.mxu1 %v1051_v25  ;;  %v858_v46 = vpack.c.bf16 %v176_v43, %v169_v42  ;;  %v183_v54 = vand.u32 4294901760, %v182_v50  ;;  %v190_v55 = vand.u32 4294901760, %v189_v51  ;;  %v874_v0 = vpack.c.bf16 %v173_v29, %v166_v28 }
  0x21   :  { %v914_v56 = vpack.c.bf16 %v202_v53, %v195_v52  ;;  %v196_v57 = vsub.f32 %v194_v47, %v195_v52  ;;  %v203_v58 = vsub.f32 %v201_v48, %v202_v53  ;;  %v878_v1 = vpack.c.bf16 %v187_v39, %v180_v38 }
  0x22   :  { %897 = vmatpush3.bf16.msra.mxu0 %v1051_v25  ;;  %v862_v59 = vpack.c.bf16 %v190_v55, %v183_v54  ;;  %v882_v2 = vpack.c.bf16 %v201_v48, %v194_v47  ;;  %v29_v4 = vand.u32 127, %v28_v3  ;;  %v1003_v6 = vmov 0.0  }
  0x23   :  { %849 = vmatpush3.bf16.msra.mxu1 %v1051_v25  ;;  %899 = vmatprep.subr.bf16.mxu0 %v1055_v30  ;;  %v197_v60 = vand.u32 4294901760, %v196_v57  ;;  %v204_v61 = vand.u32 4294901760, %v203_v58 }
  0x24   :  { %851 = vmatprep.subr.bf16.mxu1 %v1055_v30 }
  0x25   :  { %v866_v62 = vpack.c.bf16 %v204_v61, %v197_v60 }
  0x26   :  { %901 = vmatpush3.bf16.msra.mxu0 %v1055_v30 }
  0x27   :  { %853 = vmatpush3.bf16.msra.mxu1 %v1055_v30  ;;  %903 = vmatprep.subr.bf16.mxu0 %v902_v40 }
  0x28   :  { %855 = vmatprep.subr.bf16.mxu1 %v854_v41 }
  0x94   :  { %v32_v5 = vpop.permute.xlu0 %31 }
  0x95   :  { %vm36_vm1 = vcmp.eq.s32.totalorder %v32_v5, %v29_v4 }
  0x96   :  { %v656_v7 = vsel %vm36_vm1, 1.0, %v1003_v6 }
  0x97   :  { %v52_v8 = vsel %vm50_vm0, %v656_v7, 0 }
  0x98   :  { %v131_v9 = vsub.f32 %v52_v8, %v52_v8  ;;  %v35_v10 = vpop.permute.xlu0 %34 }
  0x99   :  { %vm37_vm2 = vcmp.eq.s32.totalorder %v35_v10, %v29_v4 }
  0x9a   :  { %v657_v11 = vsel %vm37_vm2, 1.0, %v1003_v6  ;;  %v132_v12 = vand.u32 4294901760, %v131_v9 }
  0x9b   :  { %v55_v15 = vsel %vm50_vm0, %v657_v11, 0 }
  0x9c   :  { %v141_v16 = vsub.f32 %v55_v15, %v55_v15  ;;  %797 = vmatprep.mubr.f32.mxu0 %v132_v12  ;;  %v133_v17 = vsub.f32 %v131_v9, %v132_v12 }
  0x9e   :  { %v134_v18 = vand.u32 4294901760, %v133_v17  ;;  %v142_v19 = vand.u32 4294901760, %v141_v16 }
  0xa0   :  { %740 = vmatprep.mubr.f32.mxu1 %v134_v18  ;;  %798 = vmatmul.mubr.f32.vlgmr.msra.gmra.mrb[0].mxu0 %v142_v19  ;;  %v143_v20 = vsub.f32 %v141_v16, %v142_v19 }
  0xa1   :  { %905 = vmatpush3.bf16.msra.mxu0 %v902_v40  ;;  %816 = vmatprep.mubr.msk.f32.mxu0 %vm50_vm0, %v656_v7 }
  0xa2   :  { %907 = vmatprep.subr.bf16.mxu0 %v1059_v35  ;;  %v144_v21 = vand.u32 4294901760, %v143_v20 }
  0xa4   :  { %741 = vmatmul.mubr.f32.vlgmr.msra.gmra.mrb[0].mxu1 %v144_v21 }
  0xa5   :  { %857 = vmatpush3.bf16.msra.mxu1 %v854_v41  ;;  %909 = vmatpush3.bf16.msra.mxu0 %v1059_v35 }
  0xa6   :  { %759 = vmatprep.mubr.msk.f32.mxu1 %vm50_vm0, %v656_v7  ;;  %859 = vmatprep.subr.bf16.mxu1 %v858_v46 }
  0xa7   :  { %911 = vmatprep.subr.bf16.mxu0 %v910_v49 }
  0xa9   :  { %861 = vmatpush3.bf16.msra.mxu1 %v858_v46  ;;  %913 = vmatpush3.bf16.msra.mxu0 %v910_v49 }
  0xaa   :  { %863 = vmatprep.subr.bf16.mxu1 %v862_v59  ;;  %915 = vmatprep.subr.bf16.mxu0 %v914_v56 }
  0xad   :  { %865 = vmatpush3.bf16.msra.mxu1 %v862_v59  ;;  %917 = vmatpush3.bf16.msra.mxu0 %v914_v56 }
  0xae   :  { %867 = vmatprep.subr.bf16.mxu1 %v866_v62  ;;  %919 = vmatprep.subr.bf16.mxu0 %v1041_v13 }
  0xb0   :  { %817 = vmatmul.mubr.msk.f32.vlgmr.msra.gmra.mrb[0].mxu0 %vm50_vm0, %v657_v11 }
  0xb1   :  { %869 = vmatpush3.bf16.msra.mxu1 %v866_v62  ;;  %921 = vmatpush3.bf16.msra.mxu0 %v1041_v13 }
  0xb2   :  { %835 = vmatprep.mubr.msk.f32.mxu0 %vm50_vm0, %v656_v7  ;;  %871 = vmatprep.subr.bf16.mxu1 %v870_v63 }
  0xb3   :  { %923 = vmatprep.subr.bf16.mxu0 %v1043_v14 }
  0xb4   :  { %760 = vmatmul.mubr.msk.f32.vlgmr.msra.gmra.mrb[0].mxu1 %vm50_vm0, %v657_v11 }
  0xb5   :  { %873 = vmatpush3.bf16.msra.mxu1 %v870_v63  ;;  %778 = vmatprep.mubr.f32.mxu1 %v131_v9 }
  0xb6   :  { %925 = vmatpush3.bf16.msra.mxu0 %v1043_v14  ;;  %875 = vmatprep.subr.bf16.mxu1 %v874_v0 }
  0xb7   :  { %927 = vmatprep.subr.bf16.mxu0 %v1051_v25 }
  0xb9   :  { %877 = vmatpush3.bf16.msra.mxu1 %v874_v0 }
  0xba   :  { %929 = vmatpush3.bf16.msra.mxu0 %v1051_v25  ;;  %879 = vmatprep.subr.bf16.mxu1 %v878_v1 }
  0xbb   :  { %931 = vmatprep.subr.bf16.mxu0 %v1055_v30 }
  0xbd   :  { %881 = vmatpush3.bf16.msra.mxu1 %v878_v1 }
  0xbe   :  { %933 = vmatpush3.bf16.msra.mxu0 %v1055_v30  ;;  %883 = vmatprep.subr.bf16.mxu1 %v882_v2 }
  0xc1   :  { %836 = vmatmul.mubr.msk.f32.vlgmr.msra.gmra.mrb[0].mxu0 %vm50_vm0, %v657_v11  ;;  %885 = vmatpush3.bf16.msra.mxu1 %v882_v2 }
  0xc4   :  { %779 = vmatmul.mubr.f32.vlgmr.msra.gmra.mrb[0].mxu1 %v141_v16 }
 0x194   :  { %v837_v13 = vpop.f32.mrb[0].mxu0 }
 0x195   :  { %v627_v22 = vpop.f32.mrb[1].mxu0 }
 0x197   :  { %v780_v14 = vpop.f32.mrb[0].mxu1 }
 0x198   :  { %v934_v23 = vadd.f32 %v837_v13, %v780_v14  ;;  %v351_v24 = vpop.f32.mrb[1].mxu1 }
 0x199   :  { %v935_v26 = vadd.f32 %v627_v22, %v351_v24 }
 0x19a   :  { %638 = vst [vmem:[#allocation5 + $0x8] sm:$0xff] %v934_v23 }
 0x19b   :  { %637 = vst [vmem:[#allocation5] sm:$0xff] %v935_v26 }
 0x19c   :  { %984 = shalt.err (!%p981_p12)
}
 0x19d   :  { %s985_s30 = scalar_lea.hbm %s1102_s2, 256 }
 0x19e   :  { %p986_p13 = scmp.ne.s32.totalorder %s1102_s2, %s985_s30  ;;  %p989_p0 = scmp.lt.u32.totalorder %s985_s30, %s1102_s2 }
 0x1a0   :  { %p991_p1 = pnand %p989_p0, %p986_p13 }
 0x1a2   :  { %994 = shalt.err (!%p991_p1)
}
 0x1a3   :  { %650 = dma.vmem_to_hbm [thread:$0]  %s645_s1, 256, %s1102_s2, [#allocation4], %s1000_s19, %s1000_s19, %s1001_s20  }
 0x1a4   :  { %997 = dma.done.wait [#allocation4], 256  }
 0x1a5   :  { %998 = vsyncadd [#allocation4], 4294967040 }
 0x1a6   :  { %654 = vsyncpa [#allocation3], 1 }
 0x1a7   :  { %655 = vsyncpa [#allocation4], 1 }

</bundles_post_ra>
